<compile_context>
chip_gen: v7x
topology: tpu7x:2x2x1
jax: 0.10.0
libtpu: 0.0.40
codegen_flags: <defaults>
</compile_context>

<pallas_src>
import functools

import jax
import jax.numpy as jnp
from jax.experimental import pallas as pl
from jax.experimental.pallas import tpu as pltpu


def _conv_shift_matmul_kernel(x_ref, w_ref, o_ref, *, fh, fw, W, owide):
    """One batch element per grid step.

    x_ref: (1, Cin, Lp)          flattened spatial input (+ fw-1 slack), compute dtype
    w_ref: (fh*fw, Cout, Cin)    per-tap weight matrices (resident)
    o_ref: (1, Cout, owide)      "wide" output, owide = OH*W, f32
    """
    cout = w_ref.shape[1]
    acc = jnp.zeros((cout, owide), jnp.float32)
    for kh in range(fh):            # fh*fw is small & static -> fully unrolled
        for kw in range(fw):
            s = kh * W + kw                      # flat shift of this filter tap
            xs = x_ref[0, :, s:s + owide]        # (Cin, owide), contiguous lane slice
            wkk = w_ref[kh * fw + kw]            # (Cout, Cin)
            acc = acc + jnp.dot(wkk, xs, preferred_element_type=jnp.float32)
    o_ref[0] = acc


def band_block_forward(x, weight, *, compute_dtype=jnp.bfloat16):
    """Pallas implementation of BandBlock.forward (valid conv, stride 1, no bias).

    x:      [N, Cin, H, W]        (NCHW)
    weight: [Cout, Cin, fh, fw]   (OIHW, == self.dict_tensor)
    returns [N, Cout, H-fh+1, W-fw+1] float32.

    compute_dtype: dtype of the streamed input / weights (accumulation is always f32).
    Default bfloat16 halves HBM read bytes; pass None to keep x.dtype.
    """
    N, Cin, H, W = x.shape
    Cout, Cin_w, fh, fw = weight.shape
    assert Cin == Cin_w, (Cin, Cin_w)
    OH, OW = H - fh + 1, W - fw + 1
    owide = OH * W                                   # "wide" output row stride == W
    cd = x.dtype if compute_dtype is None else jnp.dtype(compute_dtype)

    # Flatten spatial dims and add fw-1 slack so the last-tap slices stay in bounds.
    # This cast+pad is the only pre-kernel copy (~1x input size; bf16 halves the write).
    Lp = H * W + (fw - 1)
    x_flat = jnp.pad(x.astype(cd).reshape(N, Cin, H * W),
                     ((0, 0), (0, 0), (0, Lp - H * W)))

    # w_r[kh*fw + kw, o, c] == weight[o, c, kh, kw]   (tiny, resident in VMEM)
    w_r = weight.astype(cd).transpose(2, 3, 0, 1).reshape(fh * fw, Cout, Cin)

    cbytes = jnp.dtype(cd).itemsize
    try:
        vmem_cap = int(pltpu.get_tpu_info().vmem_capacity_bytes)
    except Exception:
        vmem_cap = 64 << 20                          # v7x per-TensorCore VMEM (smallest)
    # double-buffered x/out tiles + single resident weight tile, generous headroom
    per_step = Cin * Lp * cbytes + Cout * owide * 4
    vmem_needed = 2 * per_step + fh * fw * Cout * Cin * cbytes
    vmem_limit = int(min(max(4 * vmem_needed, 16 << 20), int(0.75 * vmem_cap)))

    cost = pl.CostEstimate(
        flops=2 * N * Cout * Cin * fh * fw * owide,
        transcendentals=0,
        bytes_accessed=(N * Cin * Lp * cbytes
                        + fh * fw * Cout * Cin * cbytes
                        + N * Cout * owide * 4),
    )

    out_wide = pl.pallas_call(
        functools.partial(_conv_shift_matmul_kernel, fh=fh, fw=fw, W=W, owide=owide),
        out_shape=jax.ShapeDtypeStruct((N, Cout, owide), jnp.float32),
        grid_spec=pltpu.PrefetchScalarGridSpec(
            num_scalar_prefetch=0,
            grid=(N,),
            in_specs=[
                pl.BlockSpec((1, Cin, Lp), lambda n: (n, 0, 0)),          # input, once/batch
                pl.BlockSpec((fh * fw, Cout, Cin), lambda n: (0, 0, 0)),  # weights resident
            ],
            out_specs=pl.BlockSpec((1, Cout, owide), lambda n: (n, 0, 0)),
        ),
        compiler_params=pltpu.CompilerParams(
            dimension_semantics=("parallel",),       # batch steps split across TCs on v7x
            vmem_limit_bytes=vmem_limit,
        ),
        cost_estimate=cost,
    )(x_flat, w_r)

    # Wide -> compact: drop the fw-1 invalid columns per output row.  Leading axes are
    # already (N, Cout), so no transpose; the reshape is free, the slice fuses under jit.
    out = out_wide.reshape(N, Cout, OH, W)[:, :, :, :OW]
    return out


if __name__ == "__main__":
    # BandBlock(spams_param, filters_shape=(3, 3), dict_size=8, channels_in=4)
    N, Cin, H, W = 2, 4, 16, 16
    fh, fw = 3, 3
    dict_size = 8  # == channels_out

    key = jax.random.PRNGKey(0)
    kx, kw_key = jax.random.split(key)
    x = jax.random.normal(kx, (N, Cin, H, W), dtype=jnp.float32)
    # deterministic stand-in for the learned dictionary tensor (spams.trainDL is host-side)
    dict_tensor = jax.random.normal(kw_key, (dict_size, Cin, fh, fw), dtype=jnp.float32)

    fwd = jax.jit(band_block_forward)
    out = jax.block_until_ready(fwd(x, dict_tensor))

    # Dtype-aware reference: same bf16-rounded inputs, f32 math (matches kernel numerics
    # up to f32 accumulation order). bf16 products are exact in f32, so tolerance is tight.
    cd = jnp.bfloat16
    ref = jax.lax.conv_general_dilated(
        x.astype(cd).astype(jnp.float32),
        dict_tensor.astype(cd).astype(jnp.float32),
        window_strides=(1, 1), padding="VALID",
        dimension_numbers=("NCHW", "OIHW", "NCHW"),
    )
    assert out.shape == (N, dict_size, H - fh + 1, W - fw + 1), out.shape
    max_err = float(jnp.max(jnp.abs(out - ref)))
    assert jnp.allclose(out, ref, atol=1e-3, rtol=1e-3), max_err
    print("KERNEL_OK")
</pallas_src>

<mosaic_0001>
module attributes {stable_mosaic.version = 11 : i64} {
  func.func @_conv_shift_matmul_kernel(%arg0: i32, %arg1: memref<1x4x258xbf16, #tpu.memory_space<vmem>>, %arg2: memref<9x8x4xbf16, #tpu.memory_space<vmem>>, %arg3: memref<1x8x224xf32, #tpu.memory_space<vmem>>) attributes {dimension_semantics = [#tpu.dimension_semantics<parallel>], iteration_bounds = array<i64: 2>, scalar_prefetch = 0 : i64, scratch_operands = 0 : i64, tpu.core_type = #tpu.core_type<tc>, window_params = [{transform_indices = @transform_0, window_bounds = array<i64: 1, 4, 258>}, {pipeline_mode = #tpu.pipeline_mode<synchronous>, transform_indices = @transform_1, window_bounds = array<i64: 9, 8, 4>}, {transform_indices = @transform_2, window_bounds = array<i64: 1, 8, 224>}]} {
    %cst = arith.constant 0.000000e+00 : f32
    %0 = vector.broadcast %cst : f32 to vector<8x224xf32>
    %c0 = arith.constant 0 : index
    %c0_0 = arith.constant 0 : index
    %c0_1 = arith.constant 0 : index
    %1 = vector.load %arg1[%c0, %c0_0, %c0_1] : memref<1x4x258xbf16, #tpu.memory_space<vmem>>, vector<1x4x224xbf16>
    %2 = vector.shape_cast %1 : vector<1x4x224xbf16> to vector<4x224xbf16>
    %c0_2 = arith.constant 0 : index
    %c0_3 = arith.constant 0 : index
    %c0_4 = arith.constant 0 : index
    %3 = vector.load %arg2[%c0_2, %c0_3, %c0_4] : memref<9x8x4xbf16, #tpu.memory_space<vmem>>, vector<1x8x4xbf16>
    %4 = vector.shape_cast %3 : vector<1x8x4xbf16> to vector<8x4xbf16>
    %cst_5 = arith.constant dense<0.000000e+00> : vector<8x224xf32>
    %5 = tpu.matmul %4, %2, %cst_5 {dimension_numbers = #tpu.dot_dimension_numbers<[1], [0], [0], [1], [0, 0, 1, 1], [], []>} : vector<8x4xbf16>, vector<4x224xbf16>, vector<8x224xf32> -> vector<8x224xf32>
    %6 = arith.addf %0, %5 : vector<8x224xf32>
    %c0_6 = arith.constant 0 : index
    %c0_7 = arith.constant 0 : index
    %c1 = arith.constant 1 : index
    %7 = vector.load %arg1[%c0_6, %c0_7, %c1] : memref<1x4x258xbf16, #tpu.memory_space<vmem>>, vector<1x4x224xbf16>
    %8 = vector.shape_cast %7 : vector<1x4x224xbf16> to vector<4x224xbf16>
    %c1_8 = arith.constant 1 : index
    %c0_9 = arith.constant 0 : index
    %c0_10 = arith.constant 0 : index
    %9 = vector.load %arg2[%c1_8, %c0_9, %c0_10] : memref<9x8x4xbf16, #tpu.memory_space<vmem>>, vector<1x8x4xbf16>
    %10 = vector.shape_cast %9 : vector<1x8x4xbf16> to vector<8x4xbf16>
    %cst_11 = arith.constant dense<0.000000e+00> : vector<8x224xf32>
    %11 = tpu.matmul %10, %8, %cst_11 {dimension_numbers = #tpu.dot_dimension_numbers<[1], [0], [0], [1], [0, 0, 1, 1], [], []>} : vector<8x4xbf16>, vector<4x224xbf16>, vector<8x224xf32> -> vector<8x224xf32>
    %12 = arith.addf %6, %11 : vector<8x224xf32>
    %c0_12 = arith.constant 0 : index
    %c0_13 = arith.constant 0 : index
    %c2 = arith.constant 2 : index
    %13 = vector.load %arg1[%c0_12, %c0_13, %c2] : memref<1x4x258xbf16, #tpu.memory_space<vmem>>, vector<1x4x224xbf16>
    %14 = vector.shape_cast %13 : vector<1x4x224xbf16> to vector<4x224xbf16>
    %c2_14 = arith.constant 2 : index
    %c0_15 = arith.constant 0 : index
    %c0_16 = arith.constant 0 : index
    %15 = vector.load %arg2[%c2_14, %c0_15, %c0_16] : memref<9x8x4xbf16, #tpu.memory_space<vmem>>, vector<1x8x4xbf16>
    %16 = vector.shape_cast %15 : vector<1x8x4xbf16> to vector<8x4xbf16>
    %cst_17 = arith.constant dense<0.000000e+00> : vector<8x224xf32>
    %17 = tpu.matmul %16, %14, %cst_17 {dimension_numbers = #tpu.dot_dimension_numbers<[1], [0], [0], [1], [0, 0, 1, 1], [], []>} : vector<8x4xbf16>, vector<4x224xbf16>, vector<8x224xf32> -> vector<8x224xf32>
    %18 = arith.addf %12, %17 : vector<8x224xf32>
    %c0_18 = arith.constant 0 : index
    %c0_19 = arith.constant 0 : index
    %c16 = arith.constant 16 : index
    %19 = vector.load %arg1[%c0_18, %c0_19, %c16] : memref<1x4x258xbf16, #tpu.memory_space<vmem>>, vector<1x4x224xbf16>
    %20 = vector.shape_cast %19 : vector<1x4x224xbf16> to vector<4x224xbf16>
    %c3 = arith.constant 3 : index
    %c0_20 = arith.constant 0 : index
    %c0_21 = arith.constant 0 : index
    %21 = vector.load %arg2[%c3, %c0_20, %c0_21] : memref<9x8x4xbf16, #tpu.memory_space<vmem>>, vector<1x8x4xbf16>
    %22 = vector.shape_cast %21 : vector<1x8x4xbf16> to vector<8x4xbf16>
    %cst_22 = arith.constant dense<0.000000e+00> : vector<8x224xf32>
    %23 = tpu.matmul %22, %20, %cst_22 {dimension_numbers = #tpu.dot_dimension_numbers<[1], [0], [0], [1], [0, 0, 1, 1], [], []>} : vector<8x4xbf16>, vector<4x224xbf16>, vector<8x224xf32> -> vector<8x224xf32>
    %24 = arith.addf %18, %23 : vector<8x224xf32>
    %c0_23 = arith.constant 0 : index
    %c0_24 = arith.constant 0 : index
    %c17 = arith.constant 17 : index
    %25 = vector.load %arg1[%c0_23, %c0_24, %c17] : memref<1x4x258xbf16, #tpu.memory_space<vmem>>, vector<1x4x224xbf16>
    %26 = vector.shape_cast %25 : vector<1x4x224xbf16> to vector<4x224xbf16>
    %c4 = arith.constant 4 : index
    %c0_25 = arith.constant 0 : index
    %c0_26 = arith.constant 0 : index
    %27 = vector.load %arg2[%c4, %c0_25, %c0_26] : memref<9x8x4xbf16, #tpu.memory_space<vmem>>, vector<1x8x4xbf16>
    %28 = vector.shape_cast %27 : vector<1x8x4xbf16> to vector<8x4xbf16>
    %cst_27 = arith.constant dense<0.000000e+00> : vector<8x224xf32>
    %29 = tpu.matmul %28, %26, %cst_27 {dimension_numbers = #tpu.dot_dimension_numbers<[1], [0], [0], [1], [0, 0, 1, 1], [], []>} : vector<8x4xbf16>, vector<4x224xbf16>, vector<8x224xf32> -> vector<8x224xf32>
    %30 = arith.addf %24, %29 : vector<8x224xf32>
    %c0_28 = arith.constant 0 : index
    %c0_29 = arith.constant 0 : index
    %c18 = arith.constant 18 : index
    %31 = vector.load %arg1[%c0_28, %c0_29, %c18] : memref<1x4x258xbf16, #tpu.memory_space<vmem>>, vector<1x4x224xbf16>
    %32 = vector.shape_cast %31 : vector<1x4x224xbf16> to vector<4x224xbf16>
    %c5 = arith.constant 5 : index
    %c0_30 = arith.constant 0 : index
    %c0_31 = arith.constant 0 : index
    %33 = vector.load %arg2[%c5, %c0_30, %c0_31] : memref<9x8x4xbf16, #tpu.memory_space<vmem>>, vector<1x8x4xbf16>
    %34 = vector.shape_cast %33 : vector<1x8x4xbf16> to vector<8x4xbf16>
    %cst_32 = arith.constant dense<0.000000e+00> : vector<8x224xf32>
    %35 = tpu.matmul %34, %32, %cst_32 {dimension_numbers = #tpu.dot_dimension_numbers<[1], [0], [0], [1], [0, 0, 1, 1], [], []>} : vector<8x4xbf16>, vector<4x224xbf16>, vector<8x224xf32> -> vector<8x224xf32>
    %36 = arith.addf %30, %35 : vector<8x224xf32>
    %c0_33 = arith.constant 0 : index
    %c0_34 = arith.constant 0 : index
    %c32 = arith.constant 32 : index
    %37 = vector.load %arg1[%c0_33, %c0_34, %c32] : memref<1x4x258xbf16, #tpu.memory_space<vmem>>, vector<1x4x224xbf16>
    %38 = vector.shape_cast %37 : vector<1x4x224xbf16> to vector<4x224xbf16>
    %c6 = arith.constant 6 : index
    %c0_35 = arith.constant 0 : index
    %c0_36 = arith.constant 0 : index
    %39 = vector.load %arg2[%c6, %c0_35, %c0_36] : memref<9x8x4xbf16, #tpu.memory_space<vmem>>, vector<1x8x4xbf16>
    %40 = vector.shape_cast %39 : vector<1x8x4xbf16> to vector<8x4xbf16>
    %cst_37 = arith.constant dense<0.000000e+00> : vector<8x224xf32>
    %41 = tpu.matmul %40, %38, %cst_37 {dimension_numbers = #tpu.dot_dimension_numbers<[1], [0], [0], [1], [0, 0, 1, 1], [], []>} : vector<8x4xbf16>, vector<4x224xbf16>, vector<8x224xf32> -> vector<8x224xf32>
    %42 = arith.addf %36, %41 : vector<8x224xf32>
    %c0_38 = arith.constant 0 : index
    %c0_39 = arith.constant 0 : index
    %c33 = arith.constant 33 : index
    %43 = vector.load %arg1[%c0_38, %c0_39, %c33] : memref<1x4x258xbf16, #tpu.memory_space<vmem>>, vector<1x4x224xbf16>
    %44 = vector.shape_cast %43 : vector<1x4x224xbf16> to vector<4x224xbf16>
    %c7 = arith.constant 7 : index
    %c0_40 = arith.constant 0 : index
    %c0_41 = arith.constant 0 : index
    %45 = vector.load %arg2[%c7, %c0_40, %c0_41] : memref<9x8x4xbf16, #tpu.memory_space<vmem>>, vector<1x8x4xbf16>
    %46 = vector.shape_cast %45 : vector<1x8x4xbf16> to vector<8x4xbf16>
    %cst_42 = arith.constant dense<0.000000e+00> : vector<8x224xf32>
    %47 = tpu.matmul %46, %44, %cst_42 {dimension_numbers = #tpu.dot_dimension_numbers<[1], [0], [0], [1], [0, 0, 1, 1], [], []>} : vector<8x4xbf16>, vector<4x224xbf16>, vector<8x224xf32> -> vector<8x224xf32>
    %48 = arith.addf %42, %47 : vector<8x224xf32>
    %c0_43 = arith.constant 0 : index
    %c0_44 = arith.constant 0 : index
    %c34 = arith.constant 34 : index
    %49 = vector.load %arg1[%c0_43, %c0_44, %c34] : memref<1x4x258xbf16, #tpu.memory_space<vmem>>, vector<1x4x224xbf16>
    %50 = vector.shape_cast %49 : vector<1x4x224xbf16> to vector<4x224xbf16>
    %c8 = arith.constant 8 : index
    %c0_45 = arith.constant 0 : index
    %c0_46 = arith.constant 0 : index
    %51 = vector.load %arg2[%c8, %c0_45, %c0_46] : memref<9x8x4xbf16, #tpu.memory_space<vmem>>, vector<1x8x4xbf16>
    %52 = vector.shape_cast %51 : vector<1x8x4xbf16> to vector<8x4xbf16>
    %cst_47 = arith.constant dense<0.000000e+00> : vector<8x224xf32>
    %53 = tpu.matmul %52, %50, %cst_47 {dimension_numbers = #tpu.dot_dimension_numbers<[1], [0], [0], [1], [0, 0, 1, 1], [], []>} : vector<8x4xbf16>, vector<4x224xbf16>, vector<8x224xf32> -> vector<8x224xf32>
    %54 = arith.addf %48, %53 : vector<8x224xf32>
    %c0_48 = arith.constant 0 : index
    %c0_49 = arith.constant 0 : index
    %c0_50 = arith.constant 0 : index
    %55 = vector.load %arg3[%c0_48, %c0_49, %c0_50] : memref<1x8x224xf32, #tpu.memory_space<vmem>>, vector<1x8x224xf32>
    %56 = vector.shape_cast %55 : vector<1x8x224xf32> to vector<8x224xf32>
    %57 = vector.shape_cast %54 : vector<8x224xf32> to vector<1x8x224xf32>
    tpu.vector_store %arg3[%c0_48, %c0_49, %c0_50], %57 {strides = array<i32>} : memref<1x8x224xf32, #tpu.memory_space<vmem>>, vector<1x8x224xf32>,
    return
  }
  func.func @transform_0(%arg0: i32) -> (i32, i32, i32) {
    %c0_i32 = arith.constant 0 : i32
    %c0_i32_0 = arith.constant 0 : i32
    %c0_i32_1 = arith.constant 0 : i32
    return %arg0, %c0_i32, %c0_i32_0 : i32, i32, i32
  }
  func.func @transform_1(%arg0: i32) -> (i32, i32, i32) {
    %c0_i32 = arith.constant 0 : i32
    %c0_i32_0 = arith.constant 0 : i32
    %c0_i32_1 = arith.constant 0 : i32
    %c0_i32_2 = arith.constant 0 : i32
    return %c0_i32, %c0_i32_0, %c0_i32_1 : i32, i32, i32
  }
  func.func @transform_2(%arg0: i32) -> (i32, i32, i32) {
    %c0_i32 = arith.constant 0 : i32
    %c0_i32_0 = arith.constant 0 : i32
    %c0_i32_1 = arith.constant 0 : i32
    return %arg0, %c0_i32, %c0_i32_0 : i32, i32, i32
  }
}

</mosaic_0001>

<bundles_post_ra>
// kernel: band_block_forward.1
= control target key start
LH: loop header
LB: loop body
LE: loop exit
PB: predicated region body
PF: predicated region fallthrough
CT: control target
= control target key end

     0   :  { %s963_s9 = smov 0   ;;  %s1065_s0 = inlined_call_operand.vmem [shape: bf16[2,4,258], index: 0, kind: input, shape index: {}]   ;;  %s1066_s1 = inlined_call_operand.vmem [shape: bf16[9,8,4], index: 1, kind: input, shape index: {}]   ;;  %s1067_s2 = inlined_call_operand.vmem [shape: f32[2,8,224], index: 2, kind: output, shape index: {}]  }
   0x1 LB: > { %s836_s10 = sadd.s32 4294967295, %s936_s9   ;;  %p840_p0 = scmp.ge.s32.totalorder %s936_s9, 1  ;;  %s936_s9 = sphi %s963_s9, %s12_s9  }
   0x2   : > { %p112_p1 = scmp.lt.s32.totalorder %s936_s9, 3 }
   0x4   : > { %p113_p2 = pnand %p840_p0, %p112_p1 }
   0x5   : > { %p134_p3 = scmp.lt.s32.totalorder (!%p113_p2), %s836_s10, 1  ;;  %v938_v0 = vmov (!%p113_p2), 0   ;;  %s939_s15 = smov (!%p113_p2), 111   ;;  %v941_v3 = vmov (!%p113_p2), 1983009808   ;;  %v624_v5 = vlaneseq (!%p113_p2)  ;;  %vm168_vm0 = vcmask (!%p113_p2), 1041408  }
   0x6   : > { %116 = sbr.rel (%p113_p2) target bundleno = 406 (0x196), region = 28  ;;  %207 = vmatprep.mubr.bf16.mxu1 (!%p113_p2), %v938_v0  ;;  %465 = vmatprep.mubr.bf16.mxu0 (!%p113_p2), %v938_v0  ;;  %s940_s16 = smov (!%p113_p2), 127   ;;  %v622_v4 = vunpack.c.l.s4 (!%p113_p2), %v941_v3  ;;  %vm162_vm1 = vcmask (!%p113_p2), 1039360   ;;  %vm422_vm2 = vcmask (!%p113_p2), 908288   ;;  %vm492_vm3 = vcmask (!%p113_p2), 900096  }
   0x7   : > { %v625_v7 = vshrl.u32 (!%p113_p2), %v624_v5, 7  ;;  %s942_s17 = smov (!%p113_p2), 110   ;;  %s943_s18 = smov (!%p113_p2), 96   ;;  %v844_v27 = vld [vmem:[%s1066_s1 + $0x4] sm:$0xf] (!%p113_p2)  ;;  %vm164_vm4 = vcmask (!%p113_p2), 31744  }
   0x8   : > { %v623_v6 = vunpack.c.0.s8 (!%p113_p2), %v622_v4  ;;  %s944_s19 = smov (!%p113_p2), 126   ;;  %s945_s20 = smov (!%p113_p2), 95   ;;  %v858_v28 = vld [vmem:[%s1066_s1 + $0x10] sm:$0xf] (!%p113_p2)  ;;  %vm562_vm5 = vcmask (!%p113_p2), 785408   ;;  %vm282_vm6 = vcmask (!%p113_p2), 1031168  }
   0x9   : > { %s946_s21 = smov (!%p113_p2), 112   ;;  %s947_s22 = smov (!%p113_p2), 94   ;;  %v146_v40 = vld [vmem:[%s1066_s1] sm:$0xf] (!%p113_p2)  ;;  %v862_v41 = vld [vmem:[%s1066_s1 + $0x14] sm:$0xf] (!%p113_p2) }
   0xa   : > { %v626_v8 = vsub.s32 (!%p113_p2), %v623_v6, %v625_v7  ;;  %vm642_vm7 = vcmask (!%p113_p2), 777216   ;;  %vm352_vm8 = vcmask (!%p113_p2), 916480   ;;  %v850_v53 = vld [vmem:[%s1066_s1 + $0x8] sm:$0xf] (!%p113_p2)  ;;  %v866_v54 = vld [vmem:[%s1066_s1 + $0x18] sm:$0xf] (!%p113_p2) }
   0xb   : > { %vm723_vm9 = vcmask (!%p113_p2), 769024   ;;  %v854_v61 = vld [vmem:[%s1066_s1 + $0xc] sm:$0xf] (!%p113_p2)  ;;  %v870_v62 = vld [vmem:[%s1066_s1 + $0x1c] sm:$0xf] (!%p113_p2) }
   0xd   : > { %s1069_s10 = smov (!%p134_p3, %s836_s10), 1 }
   0xe   : > { %s909_s11 = smul.u32 6, %s1069_s10 }
  0x10   : > { %s979_s14 = scalar_lea.vmem %s1065_s0, %s909_s11 }
  0x11   : > { %v982_v1 = vld.sshfl [vmem:[%s979_s14] sm:$0x33 pattern:$0x76325410] }
  0x12   : > { %418 = vrot.lane.b32.xlu0 %v982_v1, %s939_s15  ;;  %v417_v2 = vcombine.high %v982_v1, %v982_v1  ;;  %158 = vrot.lane.b32.xlu1 %v982_v1, %s940_s16  ;;  %v616_v9 = vld [vmem:[%s979_s14] sm:$0x3f]  ;;  %v220_v31 = vsel %vm168_vm0, %v982_v1, 0 }
  0x13   : > { %v627_v10 = vrot.slane %v616_v9, %v626_v8  ;;  %v620_v12 = vcombine.high %v616_v9, %v616_v9  ;;  %v697_v14 = vld [vmem:[%s979_s14] sm:$0x3f] }
  0x14   : > { %v708_v15 = vrot.slane %v697_v14, %v626_v8  ;;  %v701_v16 = vcombine.high %v697_v14, %v697_v14 }
  0x15   : > { %v635_v11 = vcombine.high %v627_v10, %v627_v10  ;;  %v634_v13 = vrot.slane %v620_v12, %v626_v8 }
  0x16   : > { %420 = vrot.lane.b32.xlu0 %v417_v2, %s939_s15  ;;  %160 = vrot.lane.b32.xlu1 %v417_v2, %s940_s16  ;;  %v716_v17 = vcombine.high %v708_v15, %v708_v15  ;;  %v715_v18 = vrot.slane %v701_v16, %v626_v8  ;;  %s878_s15 = sshll.u32 %s1069_s10, 4 }
  0x1a   : > { %488 = vrot.lane.b32.xlu0 %v982_v1, %s942_s17  ;;  %490 = vrot.lane.b32.xlu1 %v417_v2, %s942_s17 }
  0x1e   : > { %558 = vrot.lane.b32.xlu0 %v982_v1, %s943_s18  ;;  %560 = vrot.lane.b32.xlu1 %v417_v2, %s943_s18  ;;  %s143_s18 = scalar_lea.vmem %s1067_s2, %s878_s15 }
  0x22   : > { %278 = vrot.lane.b32.xlu0 %v982_v1, %s944_s19  ;;  %280 = vrot.lane.b32.xlu1 %v417_v2, %s944_s19 }
  0x26   : > { %636 = vrot.lane.b32.xlu0 %v627_v10, %s945_s20  ;;  %638 = vrot.lane.b32.xlu1 %v635_v11, %s945_s20 }
  0x2a   : > { %640 = vrot.lane.b32.xlu0 %v634_v13, %s945_s20  ;;  %348 = vrot.lane.b32.xlu1 %v982_v1, %s946_s21  ;;  %v873_v1 = vld [vmem:[%s1066_s1 + $0x20] sm:$0xf] }
  0x2e   : > { %350 = vrot.lane.b32.xlu0 %v417_v2, %s946_s21  ;;  %717 = vrot.lane.b32.xlu1 %v708_v15, %s947_s22 }
  0x32   : > { %719 = vrot.lane.b32.xlu0 %v716_v17, %s947_s22  ;;  %721 = vrot.lane.b32.xlu1 %v715_v18, %s947_s22 }
  0x84   : > { %v419_v19 = vpop.permute.xlu0 %418  ;;  %v159_v20 = vpop.permute.xlu1 %158 }
  0x88   : > { %v421_v21 = vpop.permute.xlu0 %420  ;;  %v161_v22 = vpop.permute.xlu1 %160 }
  0x89   : > { %846 = vmatprep.subr.msk.bf16.mxu1 %vm168_vm0, %v161_v22  ;;  %860 = vmatprep.subr.msk.bf16.mxu0 %vm168_vm0, %v421_v21  ;;  %v163_v23 = vsel %vm162_vm1, %v159_v20, %v161_v22  ;;  %v423_v24 = vsel %vm422_vm2, %v419_v19, %v421_v21 }
  0x8a   : > { %v170_v25 = vsel %vm168_vm0, %v163_v23, 0  ;;  %v428_v26 = vsel %vm168_vm0, %v423_v24, 0 }
  0x8b   : > { %176 = vmatpush1.bf16.msra.mxu1 %v170_v25  ;;  %434 = vmatpush1.bf16.msra.mxu0 %v428_v26 }
  0x8c   : > { %v489_v29 = vpop.permute.xlu0 %488  ;;  %v491_v30 = vpop.permute.xlu1 %490  ;;  %848 = vmatprep.subr.msk.bf16.mxu1 %vm168_vm0, %v417_v2 }
  0x8d   : > { %v493_v32 = vsel %vm492_vm3, %v489_v29, %v491_v30  ;;  %864 = vmatprep.subr.msk.bf16.mxu0 %vm168_vm0, %v491_v30 }
  0x8e   : > { %v498_v33 = vsel %vm168_vm0, %v493_v32, 0  ;;  %847 = vmatmul.mubr.msk.bf16.vlgmr.msra.gmra.mrb[0].mxu1 %vm164_vm4, %v844_v27  ;;  %861 = vmatmul.mubr.msk.bf16.vlgmr.msra.gmra.mrb[0].mxu0 %vm164_vm4, %v858_v28 }
  0x8f   : > { %504 = vmatpush1.bf16.msra.mxu0 %v498_v33  ;;  %226 = vmatpush1.bf16.msra.mxu1 %v220_v31 }
  0x90   : > { %v559_v34 = vpop.permute.xlu0 %558  ;;  %v561_v35 = vpop.permute.xlu1 %560  ;;  %257 = vmatprep.mubr.bf16.mxu1 %v938_v0  ;;  %535 = vmatprep.mubr.bf16.mxu0 %v938_v0 }
  0x91   : > { %868 = vmatprep.subr.msk.bf16.mxu0 %vm168_vm0, %v561_v35  ;;  %v563_v38 = vsel %vm562_vm5, %v559_v34, %v561_v35 }
  0x92   : > { %v568_v42 = vsel %vm168_vm0, %v563_v38, 0 }
  0x94   : > { %v279_v36 = vpop.permute.xlu0 %278  ;;  %v281_v37 = vpop.permute.xlu1 %280 }
  0x95   : > { %v283_v39 = vsel %vm282_vm6, %v279_v36, %v281_v37  ;;  %852 = vmatprep.subr.msk.bf16.mxu1 %vm168_vm0, %v281_v37 }
  0x96   : > { %v288_v43 = vsel %vm168_vm0, %v283_v39, 0 }
  0x98   : > { %v637_v44 = vpop.permute.xlu0 %636  ;;  %v639_v45 = vpop.permute.xlu1 %638 }
  0x99   : > { %v643_v51 = vsel %vm642_vm7, %v637_v44, %v639_v45 }
  0x9a   : > { %849 = vmatmul.mubr.msk.bf16.vlgmr.msra.gmra.mrb[0].mxu1 %vm164_vm4, %v146_v40  ;;  %865 = vmatmul.mubr.msk.bf16.vlgmr.msra.gmra.mrb[0].mxu0 %vm164_vm4, %v862_v41  ;;  %v649_v55 = vsel %vm168_vm0, %v643_v51, 0 }
  0x9b   : > { %574 = vmatpush1.bf16.msra.mxu0 %v568_v42  ;;  %294 = vmatpush1.bf16.msra.mxu1 %v288_v43 }
  0x9c   : > { %v641_v46 = vpop.permute.xlu0 %640  ;;  %325 = vmatprep.mubr.bf16.mxu1 %v938_v0  ;;  %605 = vmatprep.mubr.bf16.mxu0 %v938_v0  ;;  %v349_v47 = vpop.permute.xlu1 %348 }
  0x9d   : > { %v644_v48 = vsel %vm642_vm7, %v639_v45, %v641_v46 }
  0x9e   : > { %871 = vmatprep.subr.msk.bf16.mxu0 %vm168_vm0, %v644_v48 }
  0xa0   : > { %v351_v49 = vpop.permute.xlu0 %350  ;;  %v718_v50 = vpop.permute.xlu1 %717 }
  0xa1   : > { %v353_v52 = vsel %vm352_vm8, %v349_v47, %v351_v49  ;;  %856 = vmatprep.subr.msk.bf16.mxu1 %vm168_vm0, %v351_v49 }
  0xa2   : > { %v358_v56 = vsel %vm168_vm0, %v353_v52, 0 }
  0xa4   : > { %v720_v57 = vpop.permute.xlu0 %719  ;;  %v722_v58 = vpop.permute.xlu1 %721 }
  0xa5   : > { %v725_v59 = vsel %vm723_vm9, %v720_v57, %v722_v58  ;;  %v724_v60 = vsel %vm723_vm9, %v718_v50, %v720_v57 }
  0xa6   : > { %853 = vmatmul.mubr.msk.bf16.vlgmr.msra.gmra.mrb[0].mxu1 %vm164_vm4, %v850_v53  ;;  %869 = vmatmul.mubr.msk.bf16.vlgmr.msra.gmra.mrb[0].mxu0 %vm164_vm4, %v866_v54  ;;  %v730_v63 = vsel %vm168_vm0, %v724_v60, 0 }
  0xa7   : > { %655 = vmatpush1.bf16.msra.mxu0 %v649_v55  ;;  %364 = vmatpush1.bf16.msra.mxu1 %v358_v56 }
  0xa8   : > { %395 = vmatprep.mubr.bf16.mxu1 %v938_v0  ;;  %686 = vmatprep.mubr.bf16.mxu0 %v938_v0 }
  0xa9   : > { %874 = vmatprep.subr.msk.bf16.mxu0 %vm168_vm0, %v725_v59 }
  0xb2   : > { %857 = vmatmul.mubr.msk.bf16.vlgmr.msra.gmra.mrb[0].mxu1 %vm164_vm4, %v854_v61  ;;  %872 = vmatmul.mubr.msk.bf16.vlgmr.msra.gmra.mrb[0].mxu0 %vm164_vm4, %v870_v62 }
  0xb3   : > { %736 = vmatpush1.bf16.msra.mxu0 %v730_v63  ;;  %767 = vmatprep.mubr.bf16.mxu0 %v938_v0 }
  0xbe   : > { %875 = vmatmul.mubr.msk.bf16.vlgmr.msra.gmra.mrb[0].mxu0 %vm164_vm4, %v873_v1 }
 0x185   : > { %v397_v2 = vpop.f32.mrb[0].mxu1 }
 0x186   : > { %v399_v3 = vpop.f32.mrb[1].mxu1 }
 0x187   : > { %v401_v4 = vpop.f32.mrb[2].mxu1 }
 0x188   : > { %v402_v5 = vpop.f32.mrb[3].mxu1 }
 0x191   : > { %v769_v6 = vpop.f32.mrb[0].mxu0 }
 0x192   : > { %v879_v7 = vadd.f32 %v769_v6, %v397_v2  ;;  %v771_v8 = vpop.f32.mrb[1].mxu0 }
 0x193   : > { %v880_v9 = vadd.f32 %v771_v8, %v399_v3  ;;  %v773_v0 = vpop.f32.mrb[2].mxu0 }
 0x194   : > { %778 = vst [vmem:[%s143_s18] sm:$0xff] %v879_v7  ;;  %v774_v10 = vpop.f32.mrb[3].mxu0 }
 0x195   : > { %780 = vst.msk [vmem:[%s143_s18 + $0x8] sm:$0xff] %vm562_vm5, %v880_v9 }
 0x196 PF: > { %s12_s9 = sadd.s32 1, %s936_s9  }
 0x197   : > { %p9_p4 = scmp.ge.s32.totalorder %s12_s9, 4  }
 0x199   :  { %11 = sbr.rel (!%p9_p4) target bundleno = 1 (0x1), region = 66 }

</bundles_post_ra>
